<compile_context>
chip_gen: v7x
topology: tpu7x:2x2x1
jax: 0.10.0
libtpu: 0.0.40
codegen_flags: <defaults>
</compile_context>

<pallas_src>
import functools

import jax
import jax.numpy as jnp
from jax.experimental import pallas as pl
from jax.experimental.pallas import tpu as pltpu

EPS = 1e-5

# Per-call budget for the double-buffered input streams + the resident (B, tn)
# f32 output block.  32 MiB keeps the kernel comfortably inside v7x's 64 MiB
# physical VMEM (with compiler headroom) while still allowing >=512-wide K
# tiles on realistic shapes; v5e/v6e (128 MiB) simply have extra slack.
_TILE_BUDGET_BYTES = 32 * 1024 * 1024


def _linnorm_kernel(x_ref, wt_ref, g_ref, beta_ref, o_ref, *, inv_b):
    """grid = (N out-feature tiles [parallel], K in-feature tiles [reduction])."""
    k = pl.program_id(1)

    @pl.when(k == 0)
    def _():
        o_ref[...] = jnp.zeros_like(o_ref)

    # bf16 MXU matmul with f32 accumulation directly into the resident f32
    # output block (its index_map ignores k, so it stays in VMEM across K).
    o_ref[...] += jnp.dot(
        x_ref[...], wt_ref[...], preferred_element_type=jnp.float32
    )

    @pl.when(k == pl.num_programs(1) - 1)
    def _():
        # BatchNorm1d training-mode statistics over the full batch axis (biased
        # variance), all f32.  The Linear bias is intentionally NOT added: the
        # mean subtraction cancels it and the variance is shift-invariant.
        y = o_ref[...]                                        # (B, tn) f32
        mean = jnp.sum(y, axis=0, keepdims=True) * inv_b      # (1, tn)
        ex2 = jnp.sum(y * y, axis=0, keepdims=True) * inv_b   # (1, tn)
        var = jnp.maximum(ex2 - mean * mean, 0.0)
        scale = g_ref[...] * jax.lax.rsqrt(var + EPS)         # EUP rsqrt
        shift = beta_ref[...] - mean * scale
        o_ref[...] = y * scale + shift                        # single FMA pass


def _pick_tn(out_f, want=512):
    """Largest 128-multiple tile <= `want` dividing out_f, preferring >= 2 N
    tiles so the 'parallel' axis actually shards across v7x's two TensorCores."""
    cands = [t for t in range(128, out_f + 1, 128) if out_f % t == 0]
    if not cands:
        return out_f                      # odd feature count: full-extent block
    good = [t for t in cands if t <= want and out_f // t >= 2]
    if good:
        return max(good)
    small = [t for t in cands if t <= want]
    return max(small) if small else min(cands)


def _pick_tk(in_f, B, tn, stream_budget_bytes):
    """Largest 128-multiple K tile dividing in_f whose double-buffered bf16
    streams (x: B*tk, w: tk*tn) fit the budget.  If it is in_f itself, x's
    block index becomes constant and the activation is DMA'd exactly once."""
    cands = [t for t in range(128, in_f + 1, 128) if in_f % t == 0]
    if not cands:
        return in_f                       # odd in_features: single full-K block
    fit = [t for t in cands if 4 * t * (B + tn) <= stream_budget_bytes]
    if fit:
        return max(fit)
    return min(cands)


def prepare_linnorm_params(weight, gamma, beta):
    """One-time parameter prep (outside the hot path):
    weight (out_f, in_f) f32 -> wt (in_f, out_f) bf16; gamma/beta -> (1, out_f) f32.
    The Linear bias is not needed (cancelled by BatchNorm's mean subtraction)."""
    out_f = weight.shape[0]
    wt = jnp.asarray(weight.T, dtype=jnp.bfloat16)            # (in_f, out_f)
    g2 = jnp.asarray(gamma, jnp.float32).reshape(1, out_f)
    bt2 = jnp.asarray(beta, jnp.float32).reshape(1, out_f)
    return wt, g2, bt2


@functools.partial(jax.jit, static_argnames=("tn", "tk", "vmem_limit_bytes"))
def linar_norm_apply(x, wt, g2, bt2, *, tn=None, tk=None, vmem_limit_bytes=None):
    """x: (B, in_f);  wt: (in_f, out_f) bf16 (pre-transposed);
    g2/bt2: (1, out_f) f32.  Returns (B, out_f) f32.
    tn/tk=None -> auto tile selection (VMEM-budgeted, megacore-friendly)."""
    B, in_f = x.shape
    out_f = wt.shape[1]

    if tn is None:
        tn = _pick_tn(out_f)
    if tk is None:
        o_resident = 2 * B * tn * 4                            # f32 output block
        stream_budget = max(
            _TILE_BUDGET_BYTES - o_resident - (512 << 10),
            4 * 128 * (B + tn),                                # always allow tk=128
        )
        tk = _pick_tk(in_f, B, tn, stream_budget)

    assert in_f % tk == 0 and out_f % tn == 0, "tile must divide feature dims"
    assert tn % 128 == 0 or tn == out_f, "tn should be lane-dense (128-multiple)"

    # Avoid a redundant cast pass when activations are already bf16 upstream.
    x_bf16 = x if x.dtype == jnp.bfloat16 else x.astype(jnp.bfloat16)

    grid = (out_f // tn, in_f // tk)        # (parallel N tiles, reduction K tiles)

    # VMEM footprint: double-buffered bf16 streams + resident f32 output block
    # + gamma/beta, plus headroom for compiler-internal scratch.
    need = (2 * B * tk * 2) + (2 * tk * tn * 2) + (2 * B * tn * 4) + (4 * tn * 4)
    if vmem_limit_bytes is None:
        vmem_limit_bytes = int(min(max(need + need // 2, 32 * 2**20), 100 * 2**20))

    kernel = functools.partial(_linnorm_kernel, inv_b=1.0 / B)

    return pl.pallas_call(
        kernel,
        out_shape=jax.ShapeDtypeStruct((B, out_f), jnp.float32),
        grid=grid,
        in_specs=[
            pl.BlockSpec((B, tk), lambda n, k: (0, k)),   # x tile (full batch);
                                                          # constant index when tk==in_f
            pl.BlockSpec((tk, tn), lambda n, k: (k, n)),  # weight tile
            # If profiling ever shows exposed weight DMA at small B, the weight
            # spec is the one to deepen with pipeline_mode=pl.Buffered(3).
            pl.BlockSpec((1, tn), lambda n, k: (0, n)),   # gamma
            pl.BlockSpec((1, tn), lambda n, k: (0, n)),   # beta
        ],
        out_specs=pl.BlockSpec((B, tn), lambda n, k: (0, n)),  # f32 accumulator/output
        compiler_params=pltpu.CompilerParams(
            dimension_semantics=("parallel", "arbitrary"),
            vmem_limit_bytes=vmem_limit_bytes,
        ),
    )(x_bf16, wt, g2, bt2)


def linar_norm(x, weight, bias, gamma, beta, *, tn=None, tk=None):
    """Convenience wrapper: PyTorch-layout params in, forward out.
    `bias` is accepted for API parity with nn.Linear but intentionally unused:
    BatchNorm's mean subtraction cancels it exactly in the normalized output."""
    del bias
    wt, g2, bt2 = prepare_linnorm_params(weight, gamma, beta)
    return linar_norm_apply(x, wt, g2, bt2, tn=tn, tk=tk)


def _ref_forward(x, weight, bias, gamma, beta):
    y = x @ weight.T + bias
    mean = y.mean(axis=0, keepdims=True)
    var = ((y - mean) ** 2).mean(axis=0, keepdims=True)
    return gamma * (y - mean) / jnp.sqrt(var + EPS) + beta


if __name__ == "__main__":
    key = jax.random.PRNGKey(0)
    k1, k2, k3, k4, k5 = jax.random.split(key, 5)

    # Small shapes, but big enough to exercise both the auto-tiled path
    # (2 parallel N tiles, single resident-x K block) and a forced multi-K grid.
    B, in_features, out_features = 8, 512, 256

    x = jax.random.normal(k1, (B, in_features), dtype=jnp.float32)

    bound = 1.0 / jnp.sqrt(in_features)
    weight = jax.random.uniform(
        k2, (out_features, in_features), minval=-bound, maxval=bound,
        dtype=jnp.float32)
    bias = jax.random.uniform(
        k3, (out_features,), minval=-bound, maxval=bound, dtype=jnp.float32)
    gamma = 1.0 + 0.1 * jax.random.normal(k4, (out_features,), dtype=jnp.float32)
    beta = 0.1 * jax.random.normal(k5, (out_features,), dtype=jnp.float32)

    wt, g2, bt2 = prepare_linnorm_params(weight, gamma, beta)
    ref = _ref_forward(x, weight, bias, gamma, beta)

    # 1) Auto-tiled path: tn=128 (2 parallel N tiles -> megacore), tk=512 (=in_f,
    #    so x is DMA'd from HBM exactly once; grid K axis of size 1).
    out_auto = jax.block_until_ready(linar_norm_apply(x, wt, g2, bt2))
    assert out_auto.shape == (B, out_features)
    assert jnp.allclose(out_auto, ref, atol=5e-2, rtol=5e-2), "auto-tile mismatch"

    # 2) Forced small tiles: exercises the multi-step K reduction path
    #    (accumulate into the resident output block + pl.when init/finalize).
    out_tiled = jax.block_until_ready(
        linar_norm_apply(x, wt, g2, bt2, tn=128, tk=128))
    assert jnp.allclose(out_tiled, ref, atol=5e-2, rtol=5e-2), "tiled mismatch"

    print("KERNEL_OK")
</pallas_src>

<mosaic_0001>
module attributes {stable_mosaic.version = 11 : i64} {
  func.func @_linnorm_kernel(%arg0: i32, %arg1: i32, %arg2: memref<8x512xbf16, #tpu.memory_space<vmem>>, %arg3: memref<512x128xbf16, #tpu.memory_space<vmem>>, %arg4: memref<1x128xf32, #tpu.memory_space<vmem>>, %arg5: memref<1x128xf32, #tpu.memory_space<vmem>>, %arg6: memref<8x128xf32, #tpu.memory_space<vmem>>) attributes {dimension_semantics = [#tpu.dimension_semantics<parallel>, #tpu.dimension_semantics<arbitrary>], iteration_bounds = array<i64: 2, 1>, scalar_prefetch = 0 : i64, scratch_operands = 0 : i64, tpu.core_type = #tpu.core_type<tc>, window_params = [{transform_indices = @transform_0, window_bounds = array<i64: 8, 512>}, {transform_indices = @transform_1, window_bounds = array<i64: 512, 128>}, {transform_indices = @transform_2, window_bounds = array<i64: 1, 128>}, {transform_indices = @transform_3, window_bounds = array<i64: 1, 128>}, {transform_indices = @transform_4, window_bounds = array<i64: 8, 128>}]} {
    %c0_i32 = arith.constant 0 : i32
    %0 = arith.cmpi eq, %arg1, %c0_i32 : i32
    %1 = arith.extui %0 : i1 to i32
    %c0_i32_0 = arith.constant 0 : i32
    %2 = arith.cmpi ne, %1, %c0_i32_0 : i32
    scf.if %2 {
      %cst_10 = arith.constant 0.000000e+00 : f32
      %12 = vector.broadcast %cst_10 : f32 to vector<8x128xf32>
      %c0_11 = arith.constant 0 : index
      %c0_12 = arith.constant 0 : index
      %13 = vector.load %arg6[%c0_11, %c0_12] : memref<8x128xf32, #tpu.memory_space<vmem>>, vector<8x128xf32>
      tpu.vector_store %arg6[%c0_11, %c0_12], %12 {strides = array<i32>} : memref<8x128xf32, #tpu.memory_space<vmem>>, vector<8x128xf32>,
    } else {
    }
    %c0 = arith.constant 0 : index
    %c0_1 = arith.constant 0 : index
    %3 = vector.load %arg6[%c0, %c0_1] : memref<8x128xf32, #tpu.memory_space<vmem>>, vector<8x128xf32>
    %c0_2 = arith.constant 0 : index
    %c0_3 = arith.constant 0 : index
    %4 = vector.load %arg2[%c0_2, %c0_3] : memref<8x512xbf16, #tpu.memory_space<vmem>>, vector<8x512xbf16>
    %c0_4 = arith.constant 0 : index
    %c0_5 = arith.constant 0 : index
    %5 = vector.load %arg3[%c0_4, %c0_5] : memref<512x128xbf16, #tpu.memory_space<vmem>>, vector<512x128xbf16>
    %cst = arith.constant dense<0.000000e+00> : vector<8x128xf32>
    %6 = tpu.matmul %4, %5, %cst {dimension_numbers = #tpu.dot_dimension_numbers<[1], [0], [0], [1], [0, 0, 1, 1], [], []>} : vector<8x512xbf16>, vector<512x128xbf16>, vector<8x128xf32> -> vector<8x128xf32>
    %7 = arith.addf %3, %6 : vector<8x128xf32>
    %c0_6 = arith.constant 0 : index
    %c0_7 = arith.constant 0 : index
    %8 = vector.load %arg6[%c0_6, %c0_7] : memref<8x128xf32, #tpu.memory_space<vmem>>, vector<8x128xf32>
    tpu.vector_store %arg6[%c0_6, %c0_7], %7 {strides = array<i32>} : memref<8x128xf32, #tpu.memory_space<vmem>>, vector<8x128xf32>,
    %c0_i32_8 = arith.constant 0 : i32
    %9 = arith.cmpi eq, %arg1, %c0_i32_8 : i32
    %10 = arith.extui %9 : i1 to i32
    %c0_i32_9 = arith.constant 0 : i32
    %11 = arith.cmpi ne, %10, %c0_i32_9 : i32
    scf.if %11 {
      %c0_10 = arith.constant 0 : index
      %c0_11 = arith.constant 0 : index
      %12 = vector.load %arg6[%c0_10, %c0_11] : memref<8x128xf32, #tpu.memory_space<vmem>>, vector<8x128xf32>
      %cst_12 = arith.constant dense<0.000000e+00> : vector<128xf32>
      %13 = vector.multi_reduction <add>, %12, %cst_12 [0] : vector<8x128xf32> to vector<128xf32>
      %14 = vector.shape_cast %13 : vector<128xf32> to vector<1x128xf32>
      %cst_13 = arith.constant 1.250000e-01 : f32
      %15 = vector.broadcast %cst_13 : f32 to vector<1x128xf32>
      %16 = arith.mulf %14, %15 : vector<1x128xf32>
      %17 = arith.mulf %12, %12 : vector<8x128xf32>
      %cst_14 = arith.constant dense<0.000000e+00> : vector<128xf32>
      %18 = vector.multi_reduction <add>, %17, %cst_14 [0] : vector<8x128xf32> to vector<128xf32>
      %19 = vector.shape_cast %18 : vector<128xf32> to vector<1x128xf32>
      %cst_15 = arith.constant 1.250000e-01 : f32
      %20 = vector.broadcast %cst_15 : f32 to vector<1x128xf32>
      %21 = arith.mulf %19, %20 : vector<1x128xf32>
      %22 = arith.mulf %16, %16 : vector<1x128xf32>
      %23 = arith.subf %21, %22 : vector<1x128xf32>
      %cst_16 = arith.constant 0.000000e+00 : f32
      %24 = vector.broadcast %cst_16 : f32 to vector<1x128xf32>
      %25 = arith.maximumf %23, %24 : vector<1x128xf32>
      %c0_17 = arith.constant 0 : index
      %c0_18 = arith.constant 0 : index
      %26 = vector.load %arg4[%c0_17, %c0_18] : memref<1x128xf32, #tpu.memory_space<vmem>>, vector<1x128xf32>
      %cst_19 = arith.constant 9.99999974E-6 : f32
      %27 = vector.broadcast %cst_19 : f32 to vector<1x128xf32>
      %28 = arith.addf %25, %27 : vector<1x128xf32>
      %29 = math.rsqrt %28 : vector<1x128xf32>
      %30 = arith.mulf %26, %29 : vector<1x128xf32>
      %c0_20 = arith.constant 0 : index
      %c0_21 = arith.constant 0 : index
      %31 = vector.load %arg5[%c0_20, %c0_21] : memref<1x128xf32, #tpu.memory_space<vmem>>, vector<1x128xf32>
      %32 = arith.mulf %16, %30 : vector<1x128xf32>
      %33 = arith.subf %31, %32 : vector<1x128xf32>
      %34 = vector.broadcast %30 : vector<1x128xf32> to vector<8x128xf32>
      %35 = arith.mulf %12, %34 : vector<8x128xf32>
      %36 = vector.broadcast %33 : vector<1x128xf32> to vector<8x128xf32>
      %37 = arith.addf %35, %36 : vector<8x128xf32>
      %c0_22 = arith.constant 0 : index
      %c0_23 = arith.constant 0 : index
      %38 = vector.load %arg6[%c0_22, %c0_23] : memref<8x128xf32, #tpu.memory_space<vmem>>, vector<8x128xf32>
      tpu.vector_store %arg6[%c0_22, %c0_23], %37 {strides = array<i32>} : memref<8x128xf32, #tpu.memory_space<vmem>>, vector<8x128xf32>,
    } else {
    }
    return
  }
  func.func @transform_0(%arg0: i32, %arg1: i32) -> (i32, i32) {
    %c0_i32 = arith.constant 0 : i32
    %c0_i32_0 = arith.constant 0 : i32
    return %c0_i32, %arg1 : i32, i32
  }
  func.func @transform_1(%arg0: i32, %arg1: i32) -> (i32, i32) {
    %c0_i32 = arith.constant 0 : i32
    return %arg1, %arg0 : i32, i32
  }
  func.func @transform_2(%arg0: i32, %arg1: i32) -> (i32, i32) {
    %c0_i32 = arith.constant 0 : i32
    %c0_i32_0 = arith.constant 0 : i32
    return %c0_i32, %arg0 : i32, i32
  }
  func.func @transform_3(%arg0: i32, %arg1: i32) -> (i32, i32) {
    %c0_i32 = arith.constant 0 : i32
    %c0_i32_0 = arith.constant 0 : i32
    return %c0_i32, %arg0 : i32, i32
  }
  func.func @transform_4(%arg0: i32, %arg1: i32) -> (i32, i32) {
    %c0_i32 = arith.constant 0 : i32
    %c0_i32_0 = arith.constant 0 : i32
    return %c0_i32, %arg0 : i32, i32
  }
}

</mosaic_0001>

<bundles_post_ra>
// kernel: linar_norm_apply.1
= control target key start
LH: loop header
LB: loop body
LE: loop exit
PB: predicated region body
PF: predicated region fallthrough
CT: control target
= control target key end

     0   :  { %9 = vsyncpa [#allocation3], 0  ;;  %s1377_s0 = inlined_call_operand.vmem [shape: bf16[8,512], index: 0, kind: input, shape index: {}]   ;;  %s1378_s1 = inlined_call_operand.hbm [shape: bf16[512,256], index: 1, kind: input, shape index: {}]   ;;  %s1379_s2 = inlined_call_operand.vmem [shape: f32[1,256], index: 2, kind: input, shape index: {}]   ;;  %s1380_s3 = inlined_call_operand.vmem [shape: f32[1,256], index: 3, kind: input, shape index: {}]   ;;  %s1381_s4 = inlined_call_operand.hbm [shape: f32[8,256], index: 4, kind: output, shape index: {}]  }
   0x1   :  { %11 = vsyncpa [#allocation3 + $0x1], 0 }
   0x2   :  { %12 = vsyncpa [#allocation4], 0 }
   0x3   :  { %14 = vsyncpa [#allocation4 + $0x1], 0  ;;  %s1157_s15 = smov 0   ;;  %s1159_s16 = smov 0  }
   0x4   :  { %s1161_s17 = smov 0   ;;  %s1163_s18 = smov 0  }
   0x5   :  { %s1165_s19 = smov 0   ;;  %s1167_s20 = smov 0  }
   0x6 LB: > { %s815_s21 = sadd.s32 4294967295, %s1125_s20   ;;  %s816_s22 = sadd.s32 4294967294, %s1125_s20   ;;  %s1125_s20 = sphi %s1167_s20, %s20_s20   ;;  %s1121_s19 = sphi %s1165_s19, %s1395_s19   ;;  %s1117_s18 = sphi %s1163_s18, %s1394_s18   ;;  %s1113_s17 = sphi %s1161_s17, %s1393_s17   ;;  %s1109_s16 = sphi %s1159_s16, %s1392_s16   ;;  %s1105_s15 = sphi %s1157_s15, %s1391_s15  }
   0x7   : > { %s32_s23 = sadd.s32 1, %s1121_s19  ;;  %s67_s24 = sadd.s32 1, %s1113_s17 }
   0x8   : > { %p34_p0 = scmp.ge.s32.totalorder %s32_s23, 2  ;;  %p74_p1 = scmp.ne.s32.totalorder %s1113_s17, %s1109_s16 }
   0x9   : > { %p75_p2 = scmp.eq.s32.totalorder %s1125_s20, 0  ;;  %p80_p3 = scmp.ne.s32.totalorder %s1109_s16, %s1105_s15 }
   0xa   : > { %s1397_s23 = smov (%p34_p0, %s32_s23), 0  ;;  %p81_p5 = scmp.eq.s32.totalorder %s815_s21, 0 }
   0xb   : > { %p1198_p4 = por %p75_p2, %p74_p1  ;;  %s63_s26 = ssub.s32 %s1121_s19, %s1397_s23 }
   0xc   : > { %p156_p6 = scmp.eq.s32.totalorder %s815_s21, 1  ;;  %p65_p7 = scmp.eq.s32.totalorder %s63_s26, 0 }
   0xd   : > { %p1204_p8 = por %p81_p5, %p80_p3  ;;  %p162_p10 = scmp.eq.s32.totalorder %s816_s22, 1 }
   0xe   : > { %p1208_p9 = por %p156_p6, %p74_p1  ;;  %p921_p13 = scmp.lt.s32.totalorder %s1125_s20, 2 }
   0xf   : > { %s1213_s29 = scalar_select %p65_p7, %s1113_s17, %s67_s24  }
  0x10   : > { %s1385_s28 = scalar_select %p1208_p9, 1, 0 }
  0x11   : > { %p1215_p11 = por %p162_p10, %p80_p3  ;;  %s191_s5 = sand.u32 1, %s1113_s17  }
  0x12   : > { %s820_s6 = sshll.u32 %s191_s5, 8  ;;  %s821_s7 = sshll.u32 %s1121_s19, 6 }
  0x13   : > { %s1386_s30 = scalar_select %p1215_p11, 1, 0 }
  0x14   : > { %s1226_s10 = scalar_lea.hbm %s1378_s1, %s821_s7  ;;  %s195_s11 = scalar_lea.vmem [#allocation2], %s820_s6 }
  0x15   : > { %s204_s12 = sshll.u32 %s195_s11, 4  ;;  %p1232_p0 = pnand %p921_p13, %p1198_p4  ;;  %s1228_s12 = int_to_ptr.vmem [resolvable:$true] %s204_s12 }
  0x16   : > { %s1236_s14 = scalar_lea.sflag [#allocation3], %s191_s5  ;;  %s1013_s21 = scalar_lea.hbm %s1226_s10, 4096 }
  0x17   : > { %p1014_p1 = scmp.ne.s32.totalorder %s1226_s10, %s1013_s21  ;;  %p1015_p2 = pneg %p1232_p0 }
  0x18   : > { %s1018_s25 = scalar_lea.hbm %s1378_s1, 8192  ;;  %p1019_p4 = scmp.lt.u32.totalorder %s1226_s10, %s1378_s1 }
  0x19   : > { %p1016_p3 = pnand %p1015_p2, %p1014_p1  ;;  %p1020_p6 = scmp.lt.u32.totalorder %s1018_s25, %s1013_s21 }
  0x1a   : > { %p1022_p10 = scmp.lt.u32.totalorder %s1013_s21, %s1226_s10 }
  0x1b   : > { %p1017_p5 = pneg %p1016_p3  ;;  %p1021_p7 = por %p1020_p6, %p1019_p4 }
  0x1d   : > { %p1023_p13 = por %p1022_p10, %p1021_p7 }
  0x1f   : > { %p1024_p12 = pnand %p1023_p13, %p1017_p5 }
  0x21   : > { %1027 = shalt.err (!%p1024_p12)
}
  0x22   : > { %s1028_s5 = scalar_lea.vmem %s1228_s12, 4096  ;;  %s1127_s7 = smov [#allocation2]  }
  0x23   : > { %p1029_p1 = scmp.ne.s32.totalorder %s1228_s12, %s1028_s5  ;;  %s1033_s8 = sshll.u32 %s1127_s7, 4  ;;  %s1034_s8 = int_to_ptr.vmem [resolvable:$false] %s1033_s8 }
  0x24   : > { %s1035_s9 = scalar_lea.vmem %s1034_s8, 8192  ;;  %p1036_p9 = scmp.lt.s32.totalorder %s1228_s12, %s1034_s8 }
  0x25   : > { %p1031_p3 = pnand %p1029_p1, %p1015_p2  ;;  %p1037_p4 = scmp.lt.s32.totalorder %s1035_s9, %s1028_s5 }
  0x27   : > { %p1032_p11 = pneg %p1031_p3  ;;  %p1038_p6 = por %p1037_p4, %p1036_p9 }
  0x29   : > { %p1039_p7 = pnand %p1038_p6, %p1032_p11 }
  0x2b   : > { %1042 = shalt.err (!%p1039_p7)
}
  0x2c   : > { %s1128_s11 = smov 128   ;;  %s1129_s21 = smov 64  }
  0x2d   : > { %s1130_s22 = smov 4   ;;  %p822_p12 = scmp.ge.s32.totalorder %s1125_s20, 1 }
  0x2e   : > { %916 = dma.hbm_to_vmem [thread:$0]  (!%p1232_p0), %s1226_s10, 4096, %s1228_s12, %s1236_s14, %s1128_s11, %s1129_s21, %s1130_s22  }
  0x2f   : > { %p224_p2 = scmp.lt.s32.totalorder %s1125_s20, 3 }
  0x31   : > { %p225_p5 = pnand %p822_p12, %p224_p2 }
  0x32   : > { %s1267_s24 = sand.u32 (!%p225_p5), 1, %s1109_s16  }
  0x33   : > { %228 = sbr.rel (%p225_p5) target bundleno = 368 (0x170), region = 36  ;;  %s823_s25 = sshll.u32 (!%p225_p5), %s1267_s24, 8 }
  0x34   : > { %s231_s26 = scalar_lea.sflag (!%p225_p5), [#allocation3], %s1267_s24  ;;  %s1271_s6 = scalar_lea.vmem (!%p225_p5), [#allocation2], %s823_s25 }
  0x3a   : > { %1096 = dma.done.wait (%p1204_p8), %s231_s26, 4096  }
  0x3b   : > { %1098 = vsyncadd (%p1204_p8), %s231_s26, 4294963200  ;;  %v975_v0 = vld [vmem:[%s1271_s6 + $0x40] sm:$0xff]   ;;  %v979_v4 = vld [vmem:[%s1271_s6 + $0x48] sm:$0xff]   ;;  %p277_p8 = scmp.lt.s32.totalorder %s1117_s18, 1  ;;  %s824_s22 = sshll.u32 %s1267_s24, 3 }
  0x3c   : > { %v976_v1 = vld [vmem:[%s1271_s6 + $0xc0] sm:$0xff]   ;;  %865 = vmatprep.subr.bf16.mxu0 %v975_v0  ;;  %v980_v5 = vld [vmem:[%s1271_s6 + $0xc8] sm:$0xff]   ;;  %v983_v8 = vld [vmem:[%s1271_s6 + $0x50] sm:$0xff]   ;;  %s862_s25 = sshll.u32 %s1117_s18, 7  ;;  %s269_s26 = scalar_lea.vmem [#allocation5], %s824_s22 }
  0x3d   : > { %v977_v2 = vld [vmem:[%s1271_s6] sm:$0xff]   ;;  %887 = vmatprep.subr.bf16.mxu1 %v976_v1  ;;  %v981_v6 = vld [vmem:[%s1271_s6 + $0x8] sm:$0xff]   ;;  %v984_v9 = vld [vmem:[%s1271_s6 + $0xd0] sm:$0xff]   ;;  %s278_s14 = scalar_select %p277_p8, %s1117_s18, 1 }
  0x3e   : > { %v978_v3 = vld [vmem:[%s1271_s6 + $0x80] sm:$0xff]   ;;  %866 = vmatpush3.bf16.msra.mxu0 %v977_v2  ;;  %v982_v7 = vld [vmem:[%s1271_s6 + $0x88] sm:$0xff]   ;;  %v985_v10 = vld [vmem:[%s1271_s6 + $0x10] sm:$0xff]   ;;  %s1328_s12 = scalar_lea.hbm %s1381_s4, %s862_s25  ;;  %s689_s13 = scalar_lea.sflag [#allocation4], %s1267_s24 }
  0x3f   : > { %888 = vmatpush3.bf16.msra.mxu1 %v978_v3  ;;  %867 = vmatprep.subr.bf16.mxu0 %v979_v4  ;;  %v986_v11 = vld [vmem:[%s1271_s6 + $0x90] sm:$0xff]   ;;  %v987_v12 = vld [vmem:[%s1271_s6 + $0x58] sm:$0xff]   ;;  %v991_v16 = vld [vmem:[%s1271_s6 + $0x60] sm:$0xff]   ;;  %v674_v4 = vlaneseq  ;;  %s279_s8 = scalar_lea.vmem %s1379_s2, %s278_s14  ;;  %s282_s21 = scalar_lea.vmem %s1380_s3, %s278_s14 }
  0x40   : > { %889 = vmatprep.subr.bf16.mxu1 %v980_v5  ;;  %v988_v13 = vld [vmem:[%s1271_s6 + $0xd8] sm:$0xff]   ;;  %v992_v17 = vld [vmem:[%s1271_s6 + $0xe0] sm:$0xff]   ;;  %v995_v20 = vld [vmem:[%s1271_s6 + $0x68] sm:$0xff]   ;;  %p1388_p11 = scmp.ne.s32.totalorder %s1385_s28, 0  ;;  %s1131_s18 = smov [#allocation5]  }
  0x41   : > { %v989_v14 = vld [vmem:[%s1271_s6 + $0x18] sm:$0xff]   ;;  %v993_v18 = vld [vmem:[%s1271_s6 + $0x20] sm:$0xff]   ;;  %v996_v21 = vld [vmem:[%s1271_s6 + $0xe8] sm:$0xff]   ;;  %v675_v5 = vshrl.u32 %v674_v4, 7  ;;  %s1047_s5 = sshll.u32 %s1131_s18, 4  ;;  %s1048_s5 = int_to_ptr.vmem [resolvable:$false] %s1047_s5 }
  0x42   : > { %868 = vmatpush3.bf16.msra.mxu0 %v981_v6  ;;  %v990_v15 = vld [vmem:[%s1271_s6 + $0x98] sm:$0xff]   ;;  %v994_v19 = vld [vmem:[%s1271_s6 + $0xa0] sm:$0xff]   ;;  %v997_v22 = vld [vmem:[%s1271_s6 + $0x28] sm:$0xff]   ;;  %s1049_s7 = scalar_lea.vmem %s1048_s5, 256 }
  0x43   : > { %890 = vmatpush3.bf16.msra.mxu1 %v982_v7  ;;  %869 = vmatprep.subr.bf16.mxu0 %v983_v8  ;;  %v998_v23 = vld [vmem:[%s1271_s6 + $0xa8] sm:$0xff]   ;;  %v999_v24 = vld [vmem:[%s1271_s6 + $0x70] sm:$0xff]   ;;  %v1003_v28 = vld [vmem:[%s1271_s6 + $0x78] sm:$0xff]   ;;  %v676_v7 = vsub.s32 0, %v675_v5 }
  0x44   : > { %891 = vmatprep.subr.bf16.mxu1 %v984_v9  ;;  %v1000_v25 = vld [vmem:[%s1271_s6 + $0xf0] sm:$0xff]   ;;  %v1004_v29 = vld [vmem:[%s1271_s6 + $0xf8] sm:$0xff]  }
  0x45   : > { %v1001_v26 = vld [vmem:[%s1271_s6 + $0x30] sm:$0xff]   ;;  %v1005_v30 = vld [vmem:[%s1271_s6 + $0x38] sm:$0xff]  }
  0x46   : > { %870 = vmatpush3.bf16.msra.mxu0 %v985_v10  ;;  %v1002_v27 = vld [vmem:[%s1271_s6 + $0xb0] sm:$0xff]   ;;  %v1006_v31 = vld [vmem:[%s1271_s6 + $0xb8] sm:$0xff]   ;;  %s702_s6 = sshll.u32 %s269_s26, 4  ;;  %s1330_s6 = int_to_ptr.vmem [resolvable:$true] %s702_s6 }
  0x47   : > { %892 = vmatpush3.bf16.msra.mxu1 %v986_v11  ;;  %871 = vmatprep.subr.bf16.mxu0 %v987_v12  ;;  %v290_v32 = vld [vmem:[%s1377_s0] sm:$0xff]  ;;  %v291_v33 = vld [vmem:[%s1377_s0 + $0x8] sm:$0xff]  ;;  %s1043_s14 = scalar_lea.vmem %s1330_s6, 128  ;;  %p1050_p13 = scmp.lt.s32.totalorder %s1330_s6, %s1048_s5 }
  0x48   : > { %893 = vmatprep.subr.bf16.mxu1 %v988_v13  ;;  %v825_v34 = vcombine.low %v290_v32, %v290_v32  ;;  %v826_v35 = vcombine.high %v290_v32, %v290_v32  ;;  %v827_v36 = vcombine.low %v291_v33, %v291_v33  ;;  %v828_v37 = vcombine.high %v291_v33, %v291_v33  ;;  %v666_v6 = vld [vmem:[%s279_s8] sm:$0x1]  ;;  %p1044_p9 = scmp.ne.s32.totalorder %s1330_s6, %s1043_s14  ;;  %p1051_p1 = scmp.lt.s32.totalorder %s1049_s7, %s1043_s14 }
  0x49   : > { %v670_v10 = vld [vmem:[%s282_s21] sm:$0x1] }
  0x4a   : > { %872 = vmatpush3.bf16.msra.mxu0 %v989_v14  ;;  %594 = vmatprep.mubr.bf16.mxu0 %v826_v35  ;;  %p1045_p0 = pnand %p1044_p9, %p1388_p11  ;;  %p1052_p3 = por %p1051_p1, %p1050_p13 }
  0x4b   : > { %894 = vmatpush3.bf16.msra.mxu1 %v990_v15  ;;  %873 = vmatprep.subr.bf16.mxu0 %v991_v16 }
  0x4c   : > { %895 = vmatprep.subr.bf16.mxu1 %v992_v17  ;;  %634 = vmatprep.mubr.bf16.mxu1 %v828_v37  ;;  %p1046_p10 = pneg %p1045_p0 }
  0x4e   : > { %874 = vmatpush3.bf16.msra.mxu0 %v993_v18  ;;  %p1053_p4 = pnand %p1052_p3, %p1046_p10 }
  0x4f   : > { %896 = vmatpush3.bf16.msra.mxu1 %v994_v19  ;;  %875 = vmatprep.subr.bf16.mxu0 %v995_v20 }
  0x50   : > { %897 = vmatprep.subr.bf16.mxu1 %v996_v21 }
  0x52   : > { %876 = vmatpush3.bf16.msra.mxu0 %v997_v22 }
  0x53   : > { %898 = vmatpush3.bf16.msra.mxu1 %v998_v23  ;;  %877 = vmatprep.subr.bf16.mxu0 %v999_v24 }
  0x54   : > { %899 = vmatprep.subr.bf16.mxu1 %v1000_v25 }
  0x56   : > { %878 = vmatpush3.bf16.msra.mxu0 %v1001_v26 }
  0x57   : > { %900 = vmatpush3.bf16.msra.mxu1 %v1002_v27  ;;  %879 = vmatprep.subr.bf16.mxu0 %v1003_v28 }
  0x58   : > { %901 = vmatprep.subr.bf16.mxu1 %v1004_v29 }
  0x5a   : > { %880 = vmatpush3.bf16.msra.mxu0 %v1005_v30 }
  0x5b   : > { %902 = vmatpush3.bf16.msra.mxu1 %v1006_v31 }
  0x5d   : > { %595 = vmatmul.mubr.bf16.vlgmr.msra.gmra.mrb[0].mxu0 %v825_v34 }
  0x5e   : > { %635 = vmatmul.mubr.bf16.vlgmr.msra.gmra.mrb[0].mxu1 %v827_v36 }
 0x130   : > { %v881_v38 = vpop.f32.mrb[0].mxu0 }
 0x131   : > { %v903_v39 = vpop.f32.mrb[0].mxu1  ;;  %v882_v40 = vpop.f32.mrb[1].mxu0 }
 0x132   : > { %v904_v41 = vpop.f32.mrb[1].mxu1  ;;  %v883_v42 = vadd.f32 %v882_v40, %v881_v38  ;;  %v884_v44 = vpop.f32.mrb[2].mxu0 }
 0x133   : > { %v905_v43 = vadd.f32 %v904_v41, %v903_v39  ;;  %v906_v45 = vpop.f32.mrb[2].mxu1  ;;  %v885_v46 = vpop.f32.mrb[3].mxu0 }
 0x134   : > { %v907_v47 = vpop.f32.mrb[3].mxu1 }
 0x135   : > { %v637_v48 = vadd.f32 %v905_v43, %v883_v42 }
 0x137   : > { %v648_v49 = vrot.slane %v637_v48, 4  ;;  %v655_v50 = vmul.f32 %v637_v48, %v637_v48 }
 0x139   : > { %v649_v51 = vadd.f32 %v648_v49, %v637_v48  ;;  %v656_v52 = vrot.slane %v655_v50, 4 }
 0x13b   : > { %v650_v53 = vrot.slane %v649_v51, 2  ;;  %v657_v54 = vadd.f32 %v656_v52, %v655_v50 }
 0x13d   : > { %v651_v55 = vadd.f32 %v650_v53, %v649_v51  ;;  %v658_v56 = vrot.slane %v657_v54, 2 }
 0x13f   : > { %v652_v57 = vrot.slane %v651_v55, 1  ;;  %v659_v58 = vadd.f32 %v658_v56, %v657_v54 }
 0x141   : > { %v653_v59 = vadd.f32 %v652_v57, %v651_v55  ;;  %v660_v60 = vrot.slane %v659_v58, 1 }
 0x143   : > { %v654_v61 = vmul.f32 0.125, %v653_v59  ;;  %v661_v62 = vadd.f32 %v660_v60, %v659_v58 }
 0x145   : > { %v662_v63 = vmul.f32 0.125, %v661_v62  ;;  %v663_v0 = vmul.f32 %v654_v61, %v654_v61 }
 0x147   : > { %v664_v1 = vsub.f32 %v662_v63, %v663_v0 }
 0x149   : > { %v665_v2 = vmax.f32 %v664_v1, 0.0 }
 0x14b   : > { %v667_v3 = vadd.f32 1e-05, %v665_v2 }
 0x14d   : > { %1011 = vrsqrt.f32 %v667_v3 }
 0x157   : > { %v1012_v8 = vpop.eup %1011 }
 0x158   : > { %v669_v9 = vmul.f32 %v1012_v8, %v666_v6 }
 0x15a   : > { %v671_v11 = vmul.f32 %v669_v9, %v654_v61  ;;  %v677_v12 = vrot.slane %v669_v9, %v676_v7 }
 0x15c   : > { %v672_v13 = vsub.f32 %v670_v10, %v671_v11  ;;  %v679_v14 = vmul.f32 %v677_v12, %v637_v48 }
 0x15e   : > { %v684_v15 = vrot.slane %v672_v13, %v676_v7 }
 0x160   : > { %v686_v16 = vadd.f32 %v684_v15, %v679_v14 }
 0x162   : > { %687 = vst [vmem:[%s269_s26] sm:$0xff] %v686_v16 }
 0x163   : > { %1056 = shalt.err (!%p1053_p4)
}
 0x164   : > { %s1057_s24 = scalar_lea.hbm %s1328_s12, 128  ;;  %s1061_s11 = scalar_lea.hbm %s1381_s4, 256 }
 0x165   : > { %p1058_p6 = scmp.ne.s32.totalorder %s1328_s12, %s1057_s24  ;;  %p1062_p2 = scmp.lt.u32.totalorder %s1328_s12, %s1381_s4 }
 0x166   : > { %p1063_p5 = scmp.lt.u32.totalorder %s1061_s11, %s1057_s24  ;;  %p1065_p9 = scmp.lt.u32.totalorder %s1057_s24, %s1328_s12 }
 0x167   : > { %p1059_p7 = pnand %p1058_p6, %p1388_p11 }
 0x168   : > { %p1064_p8 = por %p1063_p5, %p1062_p2 }
 0x169   : > { %p1060_p12 = pneg %p1059_p7 }
 0x16a   : > { %p1066_p0 = por %p1065_p9, %p1064_p8 }
 0x16c   : > { %p1067_p10 = pnand %p1066_p0, %p1060_p12 }
 0x16e   : > { %1070 = shalt.err (!%p1067_p10)
}
 0x16f   : > { %911 = dma.vmem_to_hbm [thread:$0]  (%p1388_p11), %s1330_s6, 128, %s1328_s12, %s689_s13  }
 0x170 PF: > { %s714_s25 = sand.u32 1, %s1105_s15   ;;  %p1389_p13 = scmp.ne.s32.totalorder %s1386_s30, 0 }
 0x171   : > { %p1390_p1 = scmp.ge.s32.totalorder %s1125_s20, 2  ;;  %s715_s26 = scalar_lea.sflag [#allocation4], %s714_s25 }
 0x173   : > { %p918_p3 = pnand %p1390_p1, %p1389_p13 }
 0x175   : > { %1100 = dma.done.wait (!%p918_p3), %s715_s26, 128  }
 0x176   : > { %1102 = vsyncadd (!%p918_p3), %s715_s26, 4294967168  ;;  %s20_s20 = sadd.s32 1, %s1125_s20   ;;  %s1391_s15 = smov %s1109_s16 }
 0x177   : > { %p17_p4 = scmp.ge.s32.totalorder %s20_s20, 4   ;;  %s1392_s16 = smov %s1113_s17 }
 0x178   : > { %s1393_s17 = smov %s1213_s29  ;;  %s1394_s18 = smov %s1121_s19 }
 0x179   : > { %s1395_s19 = smov %s1397_s23  ;;  %19 = sbr.rel (!%p17_p4) target bundleno = 6 (0x6), region = 98 }
 0x180   :  { %720 = vsyncpa [#allocation3], 1 }
 0x181   :  { %722 = vsyncpa [#allocation3 + $0x1], 1 }
 0x182   :  { %723 = vsyncpa [#allocation4], 1 }
 0x183   :  { %725 = vsyncpa [#allocation4 + $0x1], 1 }

</bundles_post_ra>
